<compile_context>
chip_gen: v7x
topology: tpu7x:2x2x1
jax: 0.10.0
libtpu: 0.0.40
codegen_flags: <defaults>
</compile_context>

<pallas_src>
import functools
import math

import jax
import jax.numpy as jnp
import numpy as np
from jax.experimental import pallas as pl
from jax.experimental.pallas import tpu as pltpu


def _attention_block_kernel(
    xq_ref, xkv_ref, gamma_ref, beta_ref,
    wq_ref, bq_ref, wkv_ref, bkv_ref, wo_ref, bo_ref,
    wd_ref, bd_ref, wu_ref, bu_ref, scale_ref,
    o_ref,
    *, num_heads: int, compute_dtype,
):
    f32 = jnp.float32
    x = xq_ref[0].astype(f32)          # (tq, D)  raw query-tile rows (residual)
    x_kv = xkv_ref[0].astype(f32)      # (S,  D)  full sequence, for K/V
    tq, D = x.shape
    hd = D // num_heads

    gamma = gamma_ref[...]
    beta = beta_ref[...]

    # ---- LayerNorm(dim, eps=1e-6, elementwise_affine=True), f32 math ----
    def layer_norm(t):
        mean = jnp.mean(t, axis=-1, keepdims=True)
        var = jnp.mean(jnp.square(t - mean), axis=-1, keepdims=True)
        return (t - mean) * jax.lax.rsqrt(var + 1e-6) * gamma + beta

    xn_q = layer_norm(x).astype(compute_dtype)      # (tq, D) bf16 MXU input
    xn_kv = layer_norm(x_kv).astype(compute_dtype)  # (S,  D)

    # ---- projections: Q from the tile, fused K|V from the full sequence ----
    sm_scale = 1.0 / math.sqrt(hd)
    q = jnp.dot(xn_q, wq_ref[...], preferred_element_type=f32) + bq_ref[...]
    qc = (q * sm_scale).astype(compute_dtype)                        # (tq, D)
    kv = jnp.dot(xn_kv, wkv_ref[...], preferred_element_type=f32) + bkv_ref[...]
    kvc = kv.astype(compute_dtype)                                   # (S, 2D)

    # ---- attention: one head's score matrix live at a time; per-head context
    # folded directly into the lane-dense output-projection accumulator ----
    out1 = jnp.zeros((tq, D), f32)
    for h in range(num_heads):                       # static, unrolled
        qh = qc[:, h * hd:(h + 1) * hd]              # (tq, hd)
        kh = kvc[:, h * hd:(h + 1) * hd]             # (S, hd)
        vh = kvc[:, D + h * hd:D + (h + 1) * hd]     # (S, hd)
        s = jax.lax.dot_general(qh, kh, (((1,), (1,)), ((), ())),
                                preferred_element_type=f32)          # (tq, S)
        s = s - jnp.max(s, axis=-1, keepdims=True)
        p = jnp.exp(s)
        p = p * pl.reciprocal(jnp.sum(p, axis=-1, keepdims=True), approx=True)
        ctx = jnp.dot(p.astype(compute_dtype), vh,
                      preferred_element_type=f32)                    # (tq, hd)
        out1 = out1 + jnp.dot(ctx.astype(compute_dtype),
                              wo_ref[pl.ds(h * hd, hd), :],
                              preferred_element_type=f32)            # (tq, D)
    out1 = out1 + bo_ref[...]

    # ---- Adapter: up_proj(relu(down_proj(xn))) * scale (dropout p=0 => id).
    # Hidden dim is zero-padded to a lane-dense width at the call site; the
    # padded wu rows are zero, so the result is unchanged. ----
    down = jnp.dot(xn_q, wd_ref[...], preferred_element_type=f32) + bd_ref[...]
    down = jnp.maximum(down, 0.0)
    up = jnp.dot(down.astype(compute_dtype), wu_ref[...],
                 preferred_element_type=f32) + bu_ref[...]
    up = up * scale_ref[0]                            # scalar from SMEM

    # ---- residual + attention + adapter ----
    o_ref[0] = (x + out1 + up).astype(o_ref.dtype)


def _pick_q_tile(seq_len):
    for cand in (512, 256, 128, 64, 32, 16, 8):
        if cand <= seq_len and seq_len % cand == 0:
            return cand
    return seq_len


def attention_block(x, params, num_heads, *, compute_dtype=jnp.bfloat16):
    B, S, D = x.shape
    assert D % num_heads == 0
    tq = _pick_q_tile(S)
    n_q = S // tq
    cd = compute_dtype

    # --- weight preprocessing (done once, outside the kernel) ---
    wq = params["wq"].astype(cd)
    bq = params["bq"]
    wkv = jnp.concatenate([params["wk"], params["wv"]], axis=1).astype(cd)  # (D, 2D)
    bkv = jnp.concatenate([params["bk"], params["bv"]], axis=1)             # (1, 2D)
    wo = params["wo"].astype(cd)
    bo = params["bo"]

    hidden = params["wd"].shape[1]
    hidden_p = ((hidden + 127) // 128) * 128          # lane-dense adapter width
    pad = hidden_p - hidden
    wd = jnp.pad(params["wd"], ((0, 0), (0, pad))).astype(cd)
    bd = jnp.pad(params["bd"], ((0, 0), (0, pad)))
    wu = jnp.pad(params["wu"], ((0, pad), (0, 0))).astype(cd)  # zero rows -> no-op
    bu = params["bu"]
    scale = params["scale"].reshape(-1)[:1]            # (1,) scalar, lives in SMEM

    kernel = functools.partial(_attention_block_kernel,
                               num_heads=num_heads, compute_dtype=cd)

    def rep(shape):  # replicated (non-batched) operand, full-array block
        n = len(shape)
        return pl.BlockSpec(shape, lambda b, q, _n=n: (0,) * _n)

    in_specs = [
        pl.BlockSpec((1, tq, D), lambda b, q: (b, q, 0)),  # x (query tile / residual)
        pl.BlockSpec((1, S, D), lambda b, q: (b, 0, 0)),   # x (full sequence for K/V)
        rep((1, D)), rep((1, D)),                          # gamma, beta
        rep((D, D)), rep((1, D)),                          # wq, bq
        rep((D, 2 * D)), rep((1, 2 * D)),                  # wkv, bkv (fused K|V)
        rep((D, D)), rep((1, D)),                          # wo, bo
        rep((D, hidden_p)), rep((1, hidden_p)),            # wd, bd (lane-padded)
        rep((hidden_p, D)), rep((1, D)),                   # wu, bu
        pl.BlockSpec(memory_space=pltpu.MemorySpace.SMEM), # adapter scale (scalar)
    ]

    # Advisory cost estimate (flops / exp count / bytes) for the XLA scheduler.
    flops = B * (
        2 * S * D * (2 * D)        # fused K/V projection
        + 2 * S * D * D            # Q projection
        + 4 * S * S * D            # scores + context over all heads
        + 2 * S * D * D            # output projection
        + 4 * S * D * hidden_p     # adapter down + up
    )
    bytes_accessed = (
        (1 + n_q) * B * S * D * 4 + B * S * D * 4
        + (wq.size + wkv.size + wo.size + wd.size + wu.size) * 2
        + (bq.size + bkv.size + bo.size + bd.size + bu.size + 2 * D + 1) * 4
    )
    cost = pl.CostEstimate(flops=flops,
                           transcendentals=B * num_heads * S * S,
                           bytes_accessed=bytes_accessed)

    # TODO(synk): for long sequences on v7x (64 MiB VMEM) switch the per-head
    # score matmul to flash-style KV tiling and set vmem_limit_bytes explicitly.
    return pl.pallas_call(
        kernel,
        out_shape=jax.ShapeDtypeStruct((B, S, D), x.dtype),
        grid=(B, n_q),
        in_specs=in_specs,
        out_specs=pl.BlockSpec((1, tq, D), lambda b, q: (b, q, 0)),
        compiler_params=pltpu.CompilerParams(
            dimension_semantics=("parallel", "parallel")),
        cost_estimate=cost,
    )(
        x, x, params["gamma"], params["beta"],
        wq, bq, wkv, bkv, wo, bo,
        wd, bd, wu, bu, scale,
    )


def reference(x, p, num_heads):
    """Pure-JAX f32 reference mirroring the PyTorch forward pass."""
    B, S, D = x.shape
    hd = D // num_heads
    mean = jnp.mean(x, -1, keepdims=True)
    var = jnp.mean(jnp.square(x - mean), -1, keepdims=True)
    xn = (x - mean) / jnp.sqrt(var + 1e-6) * p["gamma"] + p["beta"]

    q = xn @ p["wq"] + p["bq"]
    k = xn @ p["wk"] + p["bk"]
    v = xn @ p["wv"] + p["bv"]
    qh = q.reshape(B, S, num_heads, hd).transpose(0, 2, 1, 3)
    kh = k.reshape(B, S, num_heads, hd).transpose(0, 2, 1, 3)
    vh = v.reshape(B, S, num_heads, hd).transpose(0, 2, 1, 3)
    s = (qh @ kh.transpose(0, 1, 3, 2)) / math.sqrt(hd)
    a = jax.nn.softmax(s, axis=-1) @ vh
    a = a.transpose(0, 2, 1, 3).reshape(B, S, D)
    out1 = a @ p["wo"] + p["bo"]

    down = jax.nn.relu(xn @ p["wd"] + p["bd"])
    up = (down @ p["wu"] + p["bu"]) * p["scale"][0, 0]
    return x + out1 + up


def init_params(key, dim, num_heads, r=4):
    # Deterministic synthetic init (shapes follow the module __init__).
    # NOTE: the PyTorch module zero-inits up_proj; we use small random values so
    # the adapter path is actually exercised. Forward semantics are unchanged.
    hidden = dim // r
    ks = jax.random.split(key, 10)

    def nrm(k, shape, s=0.05):
        return jax.random.normal(k, shape, jnp.float32) * s

    in_proj_w = nrm(ks[0], (3 * dim, dim))
    in_proj_b = nrm(ks[1], (3 * dim,), 0.02)
    wq, wk, wv = (in_proj_w[:dim].T, in_proj_w[dim:2 * dim].T, in_proj_w[2 * dim:].T)
    bq, bk, bv = (in_proj_b[:dim][None, :], in_proj_b[dim:2 * dim][None, :],
                  in_proj_b[2 * dim:][None, :])
    return {
        "gamma": jnp.ones((1, dim), jnp.float32),
        "beta": jnp.zeros((1, dim), jnp.float32),
        "wq": wq, "wk": wk, "wv": wv, "bq": bq, "bk": bk, "bv": bv,
        "wo": nrm(ks[2], (dim, dim)), "bo": nrm(ks[3], (1, dim), 0.02),
        "wd": nrm(ks[4], (dim, hidden)), "bd": nrm(ks[5], (1, hidden), 0.02),
        "wu": nrm(ks[6], (hidden, dim)), "bu": nrm(ks[7], (1, dim), 0.02),
        # adapter_scalar='1.0' -> fixed scale of 1.0
        "scale": jnp.ones((1, 1), jnp.float32),
    }


if __name__ == "__main__":
    B, S, D, H, R = 2, 8, 32, 4, 4
    key = jax.random.PRNGKey(0)
    kx, kp = jax.random.split(key)
    x = jax.random.normal(kx, (B, S, D), jnp.float32)
    params = init_params(kp, D, H, R)

    out = jax.block_until_ready(attention_block(x, params, H))
    ref = jax.block_until_ready(reference(x, params, H))

    # bf16 MXU inputs + approx reciprocal -> loosened tolerance vs f32 reference.
    np.testing.assert_allclose(np.asarray(out), np.asarray(ref), rtol=2e-2, atol=2e-2)
    print("KERNEL_OK")
</pallas_src>

<mosaic_0001>
module attributes {stable_mosaic.version = 11 : i64} {
  func.func @_attention_block_kernel(%arg0: i32, %arg1: i32, %arg2: memref<1x8x32xf32, #tpu.memory_space<vmem>>, %arg3: memref<1x8x32xf32, #tpu.memory_space<vmem>>, %arg4: memref<1x32xf32, #tpu.memory_space<vmem>>, %arg5: memref<1x32xf32, #tpu.memory_space<vmem>>, %arg6: memref<32x32xbf16, #tpu.memory_space<vmem>>, %arg7: memref<1x32xf32, #tpu.memory_space<vmem>>, %arg8: memref<32x64xbf16, #tpu.memory_space<vmem>>, %arg9: memref<1x64xf32, #tpu.memory_space<vmem>>, %arg10: memref<32x32xbf16, #tpu.memory_space<vmem>>, %arg11: memref<1x32xf32, #tpu.memory_space<vmem>>, %arg12: memref<32x128xbf16, #tpu.memory_space<vmem>>, %arg13: memref<1x128xf32, #tpu.memory_space<vmem>>, %arg14: memref<128x32xbf16, #tpu.memory_space<vmem>>, %arg15: memref<1x32xf32, #tpu.memory_space<vmem>>, %arg16: memref<1xf32, #tpu.memory_space<smem>>, %arg17: memref<1x8x32xf32, #tpu.memory_space<vmem>>) attributes {dimension_semantics = [#tpu.dimension_semantics<parallel>, #tpu.dimension_semantics<parallel>], iteration_bounds = array<i64: 2, 1>, scalar_prefetch = 0 : i64, scratch_operands = 0 : i64, tpu.core_type = #tpu.core_type<tc>, window_params = [{transform_indices = @transform_0, window_bounds = array<i64: 1, 8, 32>}, {transform_indices = @transform_1, window_bounds = array<i64: 1, 8, 32>}, {pipeline_mode = #tpu.pipeline_mode<synchronous>, transform_indices = @transform_2, window_bounds = array<i64: 1, 32>}, {pipeline_mode = #tpu.pipeline_mode<synchronous>, transform_indices = @transform_3, window_bounds = array<i64: 1, 32>}, {pipeline_mode = #tpu.pipeline_mode<synchronous>, transform_indices = @transform_4, window_bounds = array<i64: 32, 32>}, {pipeline_mode = #tpu.pipeline_mode<synchronous>, transform_indices = @transform_5, window_bounds = array<i64: 1, 32>}, {pipeline_mode = #tpu.pipeline_mode<synchronous>, transform_indices = @transform_6, window_bounds = array<i64: 32, 64>}, {pipeline_mode = #tpu.pipeline_mode<synchronous>, transform_indices = @transform_7, window_bounds = array<i64: 1, 64>}, {pipeline_mode = #tpu.pipeline_mode<synchronous>, transform_indices = @transform_8, window_bounds = array<i64: 32, 32>}, {pipeline_mode = #tpu.pipeline_mode<synchronous>, transform_indices = @transform_9, window_bounds = array<i64: 1, 32>}, {pipeline_mode = #tpu.pipeline_mode<synchronous>, transform_indices = @transform_10, window_bounds = array<i64: 32, 128>}, {pipeline_mode = #tpu.pipeline_mode<synchronous>, transform_indices = @transform_11, window_bounds = array<i64: 1, 128>}, {pipeline_mode = #tpu.pipeline_mode<synchronous>, transform_indices = @transform_12, window_bounds = array<i64: 128, 32>}, {pipeline_mode = #tpu.pipeline_mode<synchronous>, transform_indices = @transform_13, window_bounds = array<i64: 1, 32>}, {transform_indices = @transform_14, window_bounds = array<i64: 1>}, {transform_indices = @transform_15, window_bounds = array<i64: 1, 8, 32>}]} {
    %c0 = arith.constant 0 : index
    %c0_0 = arith.constant 0 : index
    %c0_1 = arith.constant 0 : index
    %0 = vector.load %arg2[%c0, %c0_0, %c0_1] : memref<1x8x32xf32, #tpu.memory_space<vmem>>, vector<1x8x32xf32>
    %1 = vector.shape_cast %0 : vector<1x8x32xf32> to vector<8x32xf32>
    %c0_2 = arith.constant 0 : index
    %c0_3 = arith.constant 0 : index
    %c0_4 = arith.constant 0 : index
    %2 = vector.load %arg3[%c0_2, %c0_3, %c0_4] : memref<1x8x32xf32, #tpu.memory_space<vmem>>, vector<1x8x32xf32>
    %3 = vector.shape_cast %2 : vector<1x8x32xf32> to vector<8x32xf32>
    %c0_5 = arith.constant 0 : index
    %c0_6 = arith.constant 0 : index
    %4 = vector.load %arg4[%c0_5, %c0_6] : memref<1x32xf32, #tpu.memory_space<vmem>>, vector<1x32xf32>
    %c0_7 = arith.constant 0 : index
    %c0_8 = arith.constant 0 : index
    %5 = vector.load %arg5[%c0_7, %c0_8] : memref<1x32xf32, #tpu.memory_space<vmem>>, vector<1x32xf32>
    %cst = arith.constant dense<0.000000e+00> : vector<8xf32>
    %6 = vector.multi_reduction <add>, %1, %cst [1] : vector<8x32xf32> to vector<8xf32>
    %7 = vector.shape_cast %6 : vector<8xf32> to vector<8x1xf32>
    %cst_9 = arith.constant 3.200000e+01 : f32
    %8 = vector.broadcast %cst_9 : f32 to vector<8x1xf32>
    %9 = arith.divf %7, %8 : vector<8x1xf32>
    %10 = vector.broadcast %9 : vector<8x1xf32> to vector<8x32xf32>
    %11 = arith.subf %1, %10 : vector<8x32xf32>
    %12 = arith.mulf %11, %11 : vector<8x32xf32>
    %cst_10 = arith.constant dense<0.000000e+00> : vector<8xf32>
    %13 = vector.multi_reduction <add>, %12, %cst_10 [1] : vector<8x32xf32> to vector<8xf32>
    %14 = vector.shape_cast %13 : vector<8xf32> to vector<8x1xf32>
    %cst_11 = arith.constant 3.200000e+01 : f32
    %15 = vector.broadcast %cst_11 : f32 to vector<8x1xf32>
    %16 = arith.divf %14, %15 : vector<8x1xf32>
    %17 = vector.broadcast %9 : vector<8x1xf32> to vector<8x32xf32>
    %18 = arith.subf %1, %17 : vector<8x32xf32>
    %cst_12 = arith.constant 9.99999997E-7 : f32
    %19 = vector.broadcast %cst_12 : f32 to vector<8x1xf32>
    %20 = arith.addf %16, %19 : vector<8x1xf32>
    %21 = math.rsqrt %20 : vector<8x1xf32>
    %22 = vector.broadcast %21 : vector<8x1xf32> to vector<8x32xf32>
    %23 = arith.mulf %18, %22 : vector<8x32xf32>
    %24 = vector.broadcast %4 : vector<1x32xf32> to vector<8x32xf32>
    %25 = arith.mulf %23, %24 : vector<8x32xf32>
    %26 = vector.broadcast %5 : vector<1x32xf32> to vector<8x32xf32>
    %27 = arith.addf %25, %26 : vector<8x32xf32>
    %28 = arith.truncf %27 : vector<8x32xf32> to vector<8x32xbf16>
    %cst_13 = arith.constant dense<0.000000e+00> : vector<8xf32>
    %29 = vector.multi_reduction <add>, %3, %cst_13 [1] : vector<8x32xf32> to vector<8xf32>
    %30 = vector.shape_cast %29 : vector<8xf32> to vector<8x1xf32>
    %cst_14 = arith.constant 3.200000e+01 : f32
    %31 = vector.broadcast %cst_14 : f32 to vector<8x1xf32>
    %32 = arith.divf %30, %31 : vector<8x1xf32>
    %33 = vector.broadcast %32 : vector<8x1xf32> to vector<8x32xf32>
    %34 = arith.subf %3, %33 : vector<8x32xf32>
    %35 = arith.mulf %34, %34 : vector<8x32xf32>
    %cst_15 = arith.constant dense<0.000000e+00> : vector<8xf32>
    %36 = vector.multi_reduction <add>, %35, %cst_15 [1] : vector<8x32xf32> to vector<8xf32>
    %37 = vector.shape_cast %36 : vector<8xf32> to vector<8x1xf32>
    %cst_16 = arith.constant 3.200000e+01 : f32
    %38 = vector.broadcast %cst_16 : f32 to vector<8x1xf32>
    %39 = arith.divf %37, %38 : vector<8x1xf32>
    %40 = vector.broadcast %32 : vector<8x1xf32> to vector<8x32xf32>
    %41 = arith.subf %3, %40 : vector<8x32xf32>
    %cst_17 = arith.constant 9.99999997E-7 : f32
    %42 = vector.broadcast %cst_17 : f32 to vector<8x1xf32>
    %43 = arith.addf %39, %42 : vector<8x1xf32>
    %44 = math.rsqrt %43 : vector<8x1xf32>
    %45 = vector.broadcast %44 : vector<8x1xf32> to vector<8x32xf32>
    %46 = arith.mulf %41, %45 : vector<8x32xf32>
    %47 = vector.broadcast %4 : vector<1x32xf32> to vector<8x32xf32>
    %48 = arith.mulf %46, %47 : vector<8x32xf32>
    %49 = vector.broadcast %5 : vector<1x32xf32> to vector<8x32xf32>
    %50 = arith.addf %48, %49 : vector<8x32xf32>
    %51 = arith.truncf %50 : vector<8x32xf32> to vector<8x32xbf16>
    %c0_18 = arith.constant 0 : index
    %c0_19 = arith.constant 0 : index
    %52 = vector.load %arg6[%c0_18, %c0_19] : memref<32x32xbf16, #tpu.memory_space<vmem>>, vector<32x32xbf16>
    %cst_20 = arith.constant dense<0.000000e+00> : vector<8x32xf32>
    %53 = tpu.matmul %28, %52, %cst_20 {dimension_numbers = #tpu.dot_dimension_numbers<[1], [0], [0], [1], [0, 0, 1, 1], [], []>} : vector<8x32xbf16>, vector<32x32xbf16>, vector<8x32xf32> -> vector<8x32xf32>
    %c0_21 = arith.constant 0 : index
    %c0_22 = arith.constant 0 : index
    %54 = vector.load %arg7[%c0_21, %c0_22] : memref<1x32xf32, #tpu.memory_space<vmem>>, vector<1x32xf32>
    %55 = vector.broadcast %54 : vector<1x32xf32> to vector<8x32xf32>
    %56 = arith.addf %53, %55 : vector<8x32xf32>
    %cst_23 = arith.constant 0.353553385 : f32
    %57 = vector.broadcast %cst_23 : f32 to vector<8x32xf32>
    %58 = arith.mulf %56, %57 : vector<8x32xf32>
    %59 = arith.truncf %58 : vector<8x32xf32> to vector<8x32xbf16>
    %c0_24 = arith.constant 0 : index
    %c0_25 = arith.constant 0 : index
    %60 = vector.load %arg8[%c0_24, %c0_25] : memref<32x64xbf16, #tpu.memory_space<vmem>>, vector<32x64xbf16>
    %cst_26 = arith.constant dense<0.000000e+00> : vector<8x64xf32>
    %61 = tpu.matmul %51, %60, %cst_26 {dimension_numbers = #tpu.dot_dimension_numbers<[1], [0], [0], [1], [0, 0, 1, 1], [], []>} : vector<8x32xbf16>, vector<32x64xbf16>, vector<8x64xf32> -> vector<8x64xf32>
    %c0_27 = arith.constant 0 : index
    %c0_28 = arith.constant 0 : index
    %62 = vector.load %arg9[%c0_27, %c0_28] : memref<1x64xf32, #tpu.memory_space<vmem>>, vector<1x64xf32>
    %63 = vector.broadcast %62 : vector<1x64xf32> to vector<8x64xf32>
    %64 = arith.addf %61, %63 : vector<8x64xf32>
    %65 = arith.truncf %64 : vector<8x64xf32> to vector<8x64xbf16>
    %cst_29 = arith.constant 0.000000e+00 : f32
    %66 = vector.broadcast %cst_29 : f32 to vector<8x32xf32>
    %67 = vector.extract_strided_slice %59 {offsets = [0, 0], sizes = [8, 8], strides = [1, 1]} : vector<8x32xbf16> to vector<8x8xbf16>
    %68 = vector.extract_strided_slice %65 {offsets = [0, 0], sizes = [8, 8], strides = [1, 1]} : vector<8x64xbf16> to vector<8x8xbf16>
    %69 = vector.extract_strided_slice %65 {offsets = [0, 32], sizes = [8, 8], strides = [1, 1]} : vector<8x64xbf16> to vector<8x8xbf16>
    %cst_30 = arith.constant dense<0.000000e+00> : vector<8x8xf32>
    %70 = tpu.matmul %67, %68, %cst_30 {dimension_numbers = #tpu.dot_dimension_numbers<[1], [1], [0], [0], [0, 0, 1, 0], [], []>} : vector<8x8xbf16>, vector<8x8xbf16>, vector<8x8xf32> -> vector<8x8xf32>
    %cst_31 = arith.constant dense<0xFF800000> : vector<8xf32>
    %71 = vector.multi_reduction <maximumf>, %70, %cst_31 [1] : vector<8x8xf32> to vector<8xf32>
    %72 = vector.shape_cast %71 : vector<8xf32> to vector<8x1xf32>
    %73 = vector.broadcast %72 : vector<8x1xf32> to vector<8x8xf32>
    %74 = arith.subf %70, %73 : vector<8x8xf32>
    %75 = math.exp %74 : vector<8x8xf32>
    %cst_32 = arith.constant dense<0.000000e+00> : vector<8xf32>
    %76 = vector.multi_reduction <add>, %75, %cst_32 [1] : vector<8x8xf32> to vector<8xf32>
    %77 = vector.shape_cast %76 : vector<8xf32> to vector<8x1xf32>
    %78 = tpu.reciprocal %77 {approx = true} : vector<8x1xf32> -> vector<8x1xf32>
    %79 = vector.broadcast %78 : vector<8x1xf32> to vector<8x8xf32>
    %80 = arith.mulf %75, %79 : vector<8x8xf32>
    %81 = arith.truncf %80 : vector<8x8xf32> to vector<8x8xbf16>
    %cst_33 = arith.constant dense<0.000000e+00> : vector<8x8xf32>
    %82 = tpu.matmul %81, %69, %cst_33 {dimension_numbers = #tpu.dot_dimension_numbers<[1], [0], [0], [1], [0, 0, 1, 1], [], []>} : vector<8x8xbf16>, vector<8x8xbf16>, vector<8x8xf32> -> vector<8x8xf32>
    %83 = arith.truncf %82 : vector<8x8xf32> to vector<8x8xbf16>
    %c0_34 = arith.constant 0 : index
    %c0_35 = arith.constant 0 : index
    %84 = vector.load %arg10[%c0_34, %c0_35] : memref<32x32xbf16, #tpu.memory_space<vmem>>, vector<8x32xbf16>
    %cst_36 = arith.constant dense<0.000000e+00> : vector<8x32xf32>
    %85 = tpu.matmul %83, %84, %cst_36 {dimension_numbers = #tpu.dot_dimension_numbers<[1], [0], [0], [1], [0, 0, 1, 1], [], []>} : vector<8x8xbf16>, vector<8x32xbf16>, vector<8x32xf32> -> vector<8x32xf32>
    %86 = arith.addf %66, %85 : vector<8x32xf32>
    %87 = vector.extract_strided_slice %59 {offsets = [0, 8], sizes = [8, 8], strides = [1, 1]} : vector<8x32xbf16> to vector<8x8xbf16>
    %88 = vector.extract_strided_slice %65 {offsets = [0, 8], sizes = [8, 8], strides = [1, 1]} : vector<8x64xbf16> to vector<8x8xbf16>
    %89 = vector.extract_strided_slice %65 {offsets = [0, 40], sizes = [8, 8], strides = [1, 1]} : vector<8x64xbf16> to vector<8x8xbf16>
    %cst_37 = arith.constant dense<0.000000e+00> : vector<8x8xf32>
    %90 = tpu.matmul %87, %88, %cst_37 {dimension_numbers = #tpu.dot_dimension_numbers<[1], [1], [0], [0], [0, 0, 1, 0], [], []>} : vector<8x8xbf16>, vector<8x8xbf16>, vector<8x8xf32> -> vector<8x8xf32>
    %cst_38 = arith.constant dense<0xFF800000> : vector<8xf32>
    %91 = vector.multi_reduction <maximumf>, %90, %cst_38 [1] : vector<8x8xf32> to vector<8xf32>
    %92 = vector.shape_cast %91 : vector<8xf32> to vector<8x1xf32>
    %93 = vector.broadcast %92 : vector<8x1xf32> to vector<8x8xf32>
    %94 = arith.subf %90, %93 : vector<8x8xf32>
    %95 = math.exp %94 : vector<8x8xf32>
    %cst_39 = arith.constant dense<0.000000e+00> : vector<8xf32>
    %96 = vector.multi_reduction <add>, %95, %cst_39 [1] : vector<8x8xf32> to vector<8xf32>
    %97 = vector.shape_cast %96 : vector<8xf32> to vector<8x1xf32>
    %98 = tpu.reciprocal %97 {approx = true} : vector<8x1xf32> -> vector<8x1xf32>
    %99 = vector.broadcast %98 : vector<8x1xf32> to vector<8x8xf32>
    %100 = arith.mulf %95, %99 : vector<8x8xf32>
    %101 = arith.truncf %100 : vector<8x8xf32> to vector<8x8xbf16>
    %cst_40 = arith.constant dense<0.000000e+00> : vector<8x8xf32>
    %102 = tpu.matmul %101, %89, %cst_40 {dimension_numbers = #tpu.dot_dimension_numbers<[1], [0], [0], [1], [0, 0, 1, 1], [], []>} : vector<8x8xbf16>, vector<8x8xbf16>, vector<8x8xf32> -> vector<8x8xf32>
    %103 = arith.truncf %102 : vector<8x8xf32> to vector<8x8xbf16>
    %c8 = arith.constant 8 : index
    %c0_41 = arith.constant 0 : index
    %104 = vector.load %arg10[%c8, %c0_41] : memref<32x32xbf16, #tpu.memory_space<vmem>>, vector<8x32xbf16>
    %cst_42 = arith.constant dense<0.000000e+00> : vector<8x32xf32>
    %105 = tpu.matmul %103, %104, %cst_42 {dimension_numbers = #tpu.dot_dimension_numbers<[1], [0], [0], [1], [0, 0, 1, 1], [], []>} : vector<8x8xbf16>, vector<8x32xbf16>, vector<8x32xf32> -> vector<8x32xf32>
    %106 = arith.addf %86, %105 : vector<8x32xf32>
    %107 = vector.extract_strided_slice %59 {offsets = [0, 16], sizes = [8, 8], strides = [1, 1]} : vector<8x32xbf16> to vector<8x8xbf16>
    %108 = vector.extract_strided_slice %65 {offsets = [0, 16], sizes = [8, 8], strides = [1, 1]} : vector<8x64xbf16> to vector<8x8xbf16>
    %109 = vector.extract_strided_slice %65 {offsets = [0, 48], sizes = [8, 8], strides = [1, 1]} : vector<8x64xbf16> to vector<8x8xbf16>
    %cst_43 = arith.constant dense<0.000000e+00> : vector<8x8xf32>
    %110 = tpu.matmul %107, %108, %cst_43 {dimension_numbers = #tpu.dot_dimension_numbers<[1], [1], [0], [0], [0, 0, 1, 0], [], []>} : vector<8x8xbf16>, vector<8x8xbf16>, vector<8x8xf32> -> vector<8x8xf32>
    %cst_44 = arith.constant dense<0xFF800000> : vector<8xf32>
    %111 = vector.multi_reduction <maximumf>, %110, %cst_44 [1] : vector<8x8xf32> to vector<8xf32>
    %112 = vector.shape_cast %111 : vector<8xf32> to vector<8x1xf32>
    %113 = vector.broadcast %112 : vector<8x1xf32> to vector<8x8xf32>
    %114 = arith.subf %110, %113 : vector<8x8xf32>
    %115 = math.exp %114 : vector<8x8xf32>
    %cst_45 = arith.constant dense<0.000000e+00> : vector<8xf32>
    %116 = vector.multi_reduction <add>, %115, %cst_45 [1] : vector<8x8xf32> to vector<8xf32>
    %117 = vector.shape_cast %116 : vector<8xf32> to vector<8x1xf32>
    %118 = tpu.reciprocal %117 {approx = true} : vector<8x1xf32> -> vector<8x1xf32>
    %119 = vector.broadcast %118 : vector<8x1xf32> to vector<8x8xf32>
    %120 = arith.mulf %115, %119 : vector<8x8xf32>
    %121 = arith.truncf %120 : vector<8x8xf32> to vector<8x8xbf16>
    %cst_46 = arith.constant dense<0.000000e+00> : vector<8x8xf32>
    %122 = tpu.matmul %121, %109, %cst_46 {dimension_numbers = #tpu.dot_dimension_numbers<[1], [0], [0], [1], [0, 0, 1, 1], [], []>} : vector<8x8xbf16>, vector<8x8xbf16>, vector<8x8xf32> -> vector<8x8xf32>
    %123 = arith.truncf %122 : vector<8x8xf32> to vector<8x8xbf16>
    %c16 = arith.constant 16 : index
    %c0_47 = arith.constant 0 : index
    %124 = vector.load %arg10[%c16, %c0_47] : memref<32x32xbf16, #tpu.memory_space<vmem>>, vector<8x32xbf16>
    %cst_48 = arith.constant dense<0.000000e+00> : vector<8x32xf32>
    %125 = tpu.matmul %123, %124, %cst_48 {dimension_numbers = #tpu.dot_dimension_numbers<[1], [0], [0], [1], [0, 0, 1, 1], [], []>} : vector<8x8xbf16>, vector<8x32xbf16>, vector<8x32xf32> -> vector<8x32xf32>
    %126 = arith.addf %106, %125 : vector<8x32xf32>
    %127 = vector.extract_strided_slice %59 {offsets = [0, 24], sizes = [8, 8], strides = [1, 1]} : vector<8x32xbf16> to vector<8x8xbf16>
    %128 = vector.extract_strided_slice %65 {offsets = [0, 24], sizes = [8, 8], strides = [1, 1]} : vector<8x64xbf16> to vector<8x8xbf16>
    %129 = vector.extract_strided_slice %65 {offsets = [0, 56], sizes = [8, 8], strides = [1, 1]} : vector<8x64xbf16> to vector<8x8xbf16>
    %cst_49 = arith.constant dense<0.000000e+00> : vector<8x8xf32>
    %130 = tpu.matmul %127, %128, %cst_49 {dimension_numbers = #tpu.dot_dimension_numbers<[1], [1], [0], [0], [0, 0, 1, 0], [], []>} : vector<8x8xbf16>, vector<8x8xbf16>, vector<8x8xf32> -> vector<8x8xf32>
    %cst_50 = arith.constant dense<0xFF800000> : vector<8xf32>
    %131 = vector.multi_reduction <maximumf>, %130, %cst_50 [1] : vector<8x8xf32> to vector<8xf32>
    %132 = vector.shape_cast %131 : vector<8xf32> to vector<8x1xf32>
    %133 = vector.broadcast %132 : vector<8x1xf32> to vector<8x8xf32>
    %134 = arith.subf %130, %133 : vector<8x8xf32>
    %135 = math.exp %134 : vector<8x8xf32>
    %cst_51 = arith.constant dense<0.000000e+00> : vector<8xf32>
    %136 = vector.multi_reduction <add>, %135, %cst_51 [1] : vector<8x8xf32> to vector<8xf32>
    %137 = vector.shape_cast %136 : vector<8xf32> to vector<8x1xf32>
    %138 = tpu.reciprocal %137 {approx = true} : vector<8x1xf32> -> vector<8x1xf32>
    %139 = vector.broadcast %138 : vector<8x1xf32> to vector<8x8xf32>
    %140 = arith.mulf %135, %139 : vector<8x8xf32>
    %141 = arith.truncf %140 : vector<8x8xf32> to vector<8x8xbf16>
    %cst_52 = arith.constant dense<0.000000e+00> : vector<8x8xf32>
    %142 = tpu.matmul %141, %129, %cst_52 {dimension_numbers = #tpu.dot_dimension_numbers<[1], [0], [0], [1], [0, 0, 1, 1], [], []>} : vector<8x8xbf16>, vector<8x8xbf16>, vector<8x8xf32> -> vector<8x8xf32>
    %143 = arith.truncf %142 : vector<8x8xf32> to vector<8x8xbf16>
    %c24 = arith.constant 24 : index
    %c0_53 = arith.constant 0 : index
    %144 = vector.load %arg10[%c24, %c0_53] : memref<32x32xbf16, #tpu.memory_space<vmem>>, vector<8x32xbf16>
    %cst_54 = arith.constant dense<0.000000e+00> : vector<8x32xf32>
    %145 = tpu.matmul %143, %144, %cst_54 {dimension_numbers = #tpu.dot_dimension_numbers<[1], [0], [0], [1], [0, 0, 1, 1], [], []>} : vector<8x8xbf16>, vector<8x32xbf16>, vector<8x32xf32> -> vector<8x32xf32>
    %146 = arith.addf %126, %145 : vector<8x32xf32>
    %c0_55 = arith.constant 0 : index
    %c0_56 = arith.constant 0 : index
    %147 = vector.load %arg11[%c0_55, %c0_56] : memref<1x32xf32, #tpu.memory_space<vmem>>, vector<1x32xf32>
    %148 = vector.broadcast %147 : vector<1x32xf32> to vector<8x32xf32>
    %149 = arith.addf %146, %148 : vector<8x32xf32>
    %c0_57 = arith.constant 0 : index
    %c0_58 = arith.constant 0 : index
    %150 = vector.load %arg12[%c0_57, %c0_58] : memref<32x128xbf16, #tpu.memory_space<vmem>>, vector<32x128xbf16>
    %cst_59 = arith.constant dense<0.000000e+00> : vector<8x128xf32>
    %151 = tpu.matmul %28, %150, %cst_59 {dimension_numbers = #tpu.dot_dimension_numbers<[1], [0], [0], [1], [0, 0, 1, 1], [], []>} : vector<8x32xbf16>, vector<32x128xbf16>, vector<8x128xf32> -> vector<8x128xf32>
    %c0_60 = arith.constant 0 : index
    %c0_61 = arith.constant 0 : index
    %152 = vector.load %arg13[%c0_60, %c0_61] : memref<1x128xf32, #tpu.memory_space<vmem>>, vector<1x128xf32>
    %153 = vector.broadcast %152 : vector<1x128xf32> to vector<8x128xf32>
    %154 = arith.addf %151, %153 : vector<8x128xf32>
    %cst_62 = arith.constant 0.000000e+00 : f32
    %155 = vector.broadcast %cst_62 : f32 to vector<8x128xf32>
    %156 = arith.maximumf %154, %155 : vector<8x128xf32>
    %157 = arith.truncf %156 : vector<8x128xf32> to vector<8x128xbf16>
    %c0_63 = arith.constant 0 : index
    %c0_64 = arith.constant 0 : index
    %158 = vector.load %arg14[%c0_63, %c0_64] : memref<128x32xbf16, #tpu.memory_space<vmem>>, vector<128x32xbf16>
    %cst_65 = arith.constant dense<0.000000e+00> : vector<8x32xf32>
    %159 = tpu.matmul %157, %158, %cst_65 {dimension_numbers = #tpu.dot_dimension_numbers<[1], [0], [0], [1], [0, 0, 1, 1], [], []>} : vector<8x128xbf16>, vector<128x32xbf16>, vector<8x32xf32> -> vector<8x32xf32>
    %c0_66 = arith.constant 0 : index
    %c0_67 = arith.constant 0 : index
    %160 = vector.load %arg15[%c0_66, %c0_67] : memref<1x32xf32, #tpu.memory_space<vmem>>, vector<1x32xf32>
    %161 = vector.broadcast %160 : vector<1x32xf32> to vector<8x32xf32>
    %162 = arith.addf %159, %161 : vector<8x32xf32>
    %c0_68 = arith.constant 0 : index
    %163 = memref.load %arg16[%c0_68] : memref<1xf32, #tpu.memory_space<smem>>
    %164 = vector.broadcast %163 : f32 to vector<8x32xf32>
    %165 = arith.mulf %162, %164 : vector<8x32xf32>
    %166 = arith.addf %1, %149 : vector<8x32xf32>
    %167 = arith.addf %166, %165 : vector<8x32xf32>
    %c0_69 = arith.constant 0 : index
    %c0_70 = arith.constant 0 : index
    %c0_71 = arith.constant 0 : index
    %168 = vector.load %arg17[%c0_69, %c0_70, %c0_71] : memref<1x8x32xf32, #tpu.memory_space<vmem>>, vector<1x8x32xf32>
    %169 = vector.shape_cast %168 : vector<1x8x32xf32> to vector<8x32xf32>
    %170 = vector.shape_cast %167 : vector<8x32xf32> to vector<1x8x32xf32>
    tpu.vector_store %arg17[%c0_69, %c0_70, %c0_71], %170 {strides = array<i32>} : memref<1x8x32xf32, #tpu.memory_space<vmem>>, vector<1x8x32xf32>,
    return
  }
  func.func @transform_0(%arg0: i32, %arg1: i32) -> (i32, i32, i32) {
    %c0_i32 = arith.constant 0 : i32
    %c0_i32_0 = arith.constant 0 : i32
    return %arg0, %arg1, %c0_i32 : i32, i32, i32
  }
  func.func @transform_1(%arg0: i32, %arg1: i32) -> (i32, i32, i32) {
    %c0_i32 = arith.constant 0 : i32
    %c0_i32_0 = arith.constant 0 : i32
    %c0_i32_1 = arith.constant 0 : i32
    return %arg0, %c0_i32, %c0_i32_0 : i32, i32, i32
  }
  func.func @transform_2(%arg0: i32, %arg1: i32) -> (i32, i32) {
    %c0_i32 = arith.constant 0 : i32
    %c0_i32_0 = arith.constant 0 : i32
    %c0_i32_1 = arith.constant 0 : i32
    return %c0_i32, %c0_i32_0 : i32, i32
  }
  func.func @transform_3(%arg0: i32, %arg1: i32) -> (i32, i32) {
    %c0_i32 = arith.constant 0 : i32
    %c0_i32_0 = arith.constant 0 : i32
    %c0_i32_1 = arith.constant 0 : i32
    return %c0_i32, %c0_i32_0 : i32, i32
  }
  func.func @transform_4(%arg0: i32, %arg1: i32) -> (i32, i32) {
    %c0_i32 = arith.constant 0 : i32
    %c0_i32_0 = arith.constant 0 : i32
    %c0_i32_1 = arith.constant 0 : i32
    return %c0_i32, %c0_i32_0 : i32, i32
  }
  func.func @transform_5(%arg0: i32, %arg1: i32) -> (i32, i32) {
    %c0_i32 = arith.constant 0 : i32
    %c0_i32_0 = arith.constant 0 : i32
    %c0_i32_1 = arith.constant 0 : i32
    return %c0_i32, %c0_i32_0 : i32, i32
  }
  func.func @transform_6(%arg0: i32, %arg1: i32) -> (i32, i32) {
    %c0_i32 = arith.constant 0 : i32
    %c0_i32_0 = arith.constant 0 : i32
    %c0_i32_1 = arith.constant 0 : i32
    return %c0_i32, %c0_i32_0 : i32, i32
  }
  func.func @transform_7(%arg0: i32, %arg1: i32) -> (i32, i32) {
    %c0_i32 = arith.constant 0 : i32
    %c0_i32_0 = arith.constant 0 : i32
    %c0_i32_1 = arith.constant 0 : i32
    return %c0_i32, %c0_i32_0 : i32, i32
  }
  func.func @transform_8(%arg0: i32, %arg1: i32) -> (i32, i32) {
    %c0_i32 = arith.constant 0 : i32
    %c0_i32_0 = arith.constant 0 : i32
    %c0_i32_1 = arith.constant 0 : i32
    return %c0_i32, %c0_i32_0 : i32, i32
  }
  func.func @transform_9(%arg0: i32, %arg1: i32) -> (i32, i32) {
    %c0_i32 = arith.constant 0 : i32
    %c0_i32_0 = arith.constant 0 : i32
    %c0_i32_1 = arith.constant 0 : i32
    return %c0_i32, %c0_i32_0 : i32, i32
  }
  func.func @transform_10(%arg0: i32, %arg1: i32) -> (i32, i32) {
    %c0_i32 = arith.constant 0 : i32
    %c0_i32_0 = arith.constant 0 : i32
    %c0_i32_1 = arith.constant 0 : i32
    return %c0_i32, %c0_i32_0 : i32, i32
  }
  func.func @transform_11(%arg0: i32, %arg1: i32) -> (i32, i32) {
    %c0_i32 = arith.constant 0 : i32
    %c0_i32_0 = arith.constant 0 : i32
    %c0_i32_1 = arith.constant 0 : i32
    return %c0_i32, %c0_i32_0 : i32, i32
  }
  func.func @transform_12(%arg0: i32, %arg1: i32) -> (i32, i32) {
    %c0_i32 = arith.constant 0 : i32
    %c0_i32_0 = arith.constant 0 : i32
    %c0_i32_1 = arith.constant 0 : i32
    return %c0_i32, %c0_i32_0 : i32, i32
  }
  func.func @transform_13(%arg0: i32, %arg1: i32) -> (i32, i32) {
    %c0_i32 = arith.constant 0 : i32
    %c0_i32_0 = arith.constant 0 : i32
    %c0_i32_1 = arith.constant 0 : i32
    return %c0_i32, %c0_i32_0 : i32, i32
  }
  func.func @transform_14(%arg0: i32, %arg1: i32) -> i32 {
    %c0_i32 = arith.constant 0 : i32
    %c0_i32_0 = arith.constant 0 : i32
    return %c0_i32 : i32
  }
  func.func @transform_15(%arg0: i32, %arg1: i32) -> (i32, i32, i32) {
    %c0_i32 = arith.constant 0 : i32
    %c0_i32_0 = arith.constant 0 : i32
    return %arg0, %arg1, %c0_i32 : i32, i32, i32
  }
}

</mosaic_0001>

<bundles_post_ra>
// kernel: tpu_custom_call.1
= control target key start
LH: loop header
LB: loop body
LE: loop exit
PB: predicated region body
PF: predicated region fallthrough
CT: control target
= control target key end

     0   :  { %s2643_s0 = inlined_call_operand.vmem [shape: f32[2,8,32], index: 0, kind: input, shape index: {}]   ;;  %s2644_s1 = inlined_call_operand.vmem [shape: f32[2,8,32], index: 1, kind: input, shape index: {}]   ;;  %s2645_s2 = inlined_call_operand.vmem [shape: f32[1,32], index: 2, kind: input, shape index: {}]   ;;  %s2646_s3 = inlined_call_operand.vmem [shape: f32[1,32], index: 3, kind: input, shape index: {}]   ;;  %s2647_s4 = inlined_call_operand.vmem [shape: bf16[32,32], index: 4, kind: input, shape index: {}]   ;;  %s2648_s5 = inlined_call_operand.hbm [shape: f32[1,32], index: 5, kind: input, shape index: {}]   ;;  %s2649_s6 = inlined_call_operand.vmem [shape: bf16[32,64], index: 6, kind: input, shape index: {}]   ;;  %s2650_s7 = inlined_call_operand.hbm [shape: f32[1,64], index: 7, kind: input, shape index: {}]   ;;  %s2651_s8 = inlined_call_operand.vmem [shape: bf16[32,32], index: 8, kind: input, shape index: {}]   ;;  %s2652_s9 = inlined_call_operand.vmem [shape: f32[1,32], index: 9, kind: input, shape index: {}]   ;;  %s2653_s10 = inlined_call_operand.vmem [shape: bf16[32,128], index: 10, kind: input, shape index: {}]   ;;  %s2654_s11 = inlined_call_operand.vmem [shape: f32[1,128], index: 11, kind: input, shape index: {}]   ;;  %s2655_s12 = inlined_call_operand.vmem [shape: bf16[128,32], index: 12, kind: input, shape index: {}]   ;;  %s2656_s13 = inlined_call_operand.vmem [shape: f32[1,32], index: 13, kind: input, shape index: {}]   ;;  %s2657_s14 = inlined_call_operand.<no memory space> [shape: f32[1], index: 14, kind: input, shape index: {}]   ;;  %s2658_s15 = inlined_call_operand.hbm [shape: f32[2,8,32], index: 15, kind: output, shape index: {}]  }
   0x1   :  { %2671 = sst [smem:[#allocation19_spill]] %s2658_s15 }
   0x2   :  { %20 = sst [smem:[#allocation2]] %s2657_s14 }
   0x3   :  { %21 = vsyncpa [#allocation4], 0 }
   0x4   :  { %22 = vsyncpa [#allocation7], 0 }
   0x5   :  { %23 = vsyncpa [#allocation5], 0 }
   0x6   :  { %25 = vsyncpa [#allocation5 + $0x1], 0  ;;  %s2257_s20 = smov 0   ;;  %s2259_s21 = smov 0  }
   0x7   :  { %s2261_s22 = smov 0   ;;  %s2263_s23 = smov 0  }
   0x8   :  { %s2265_s24 = smov 0   ;;  %s2267_s25 = smov 0  }
   0x9 LB: > { %2672 = sst [smem:[#allocation12_spill]] %s2140_s20  ;;  %s1689_s14 = sadd.s32 4294967295, %s2160_s25   ;;  %s2160_s25 = sphi %s2267_s25, %s31_s25   ;;  %s2156_s24 = sphi %s2265_s24, %s2695_s24   ;;  %s2152_s23 = sphi %s2263_s23, %s2694_s23   ;;  %s2148_s22 = sphi %s2261_s22, %s2698_s22   ;;  %s2144_s21 = sphi %s2259_s21, %s2697_s21   ;;  %s2140_s20 = sphi %s2257_s20, %s2696_s20  }
   0xa   : > { %2673 = sst [smem:[#allocation13_spill]] %s2148_s22  ;;  %s1690_s26 = sadd.s32 4294967294, %s2160_s25  }
   0xb   : > { %2674 = sst [smem:[#allocation14_spill]] %s2156_s24  ;;  %s43_s27 = sadd.s32 1, %s2156_s24 }
   0xc   : > { %2675 = sst [smem:[#allocation15_spill]] %s2160_s25  ;;  %s379_s28 = sadd.s32 1, %s2148_s22 }
   0xd   : > { %p45_p0 = scmp.ge.s32.totalorder %s43_s27, 2  ;;  %p389_p1 = scmp.ne.s32.totalorder %s2148_s22, %s2144_s21 }
   0xe   : > { %p390_p2 = scmp.eq.s32.totalorder %s1689_s14, 1  ;;  %p395_p3 = scmp.ne.s32.totalorder %s2144_s21, %s2140_s20 }
   0xf   : > { %s2700_s27 = smov (%p45_p0, %s43_s27), 0  ;;  %p396_p5 = scmp.eq.s32.totalorder %s1690_s26, 1 }
  0x10   : > { %2676 = sst [smem:[#allocation16_spill]] %s2700_s27  ;;  %p2297_p4 = por %p390_p2, %p389_p1 }
  0x11   : > { %s374_s30 = ssub.s32 %s2156_s24, %s2700_s27  ;;  %p1691_p6 = scmp.ge.s32.totalorder %s2160_s25, 1 }
  0x12   : > { %s2677_s29 = scalar_select %p2297_p4, 1, 0 }
  0x13   : > { %p377_p7 = scmp.eq.s32.totalorder %s374_s30, 0  ;;  %p2304_p8 = por %p396_p5, %p395_p3 }
  0x14   : > { %p403_p9 = scmp.lt.s32.totalorder %s2160_s25, 3  ;;  %p2316_p11 = scmp.eq.s32.totalorder %s1689_s14, 0 }
  0x15   : > { %s2678_s16 = scalar_select %p2304_p8, 1, 0 }
  0x16   : > { %s2310_s17 = scalar_select %p377_p7, %s2148_s22, %s379_s28  }
  0x17   : > { %2679 = sst [smem:[#allocation17_spill]] %s2678_s16  ;;  %p2312_p10 = pnand %p1691_p6, %p403_p9 }
  0x18   : > { %2680 = sst [smem:[#allocation18_spill]] %s2310_s17  ;;  %s2162_s26 = smov [#allocation3]  }
  0x19   : > { %s2681_s18 = scalar_select %p2312_p10, 1, 0 }
  0x1a   : > { %s2682_s19 = scalar_select %p2316_p11, 1, 0 }
  0x1b   : > { %p1909_p12 = pneg %p2312_p10  ;;  %s425_s30 = sshll.u32 %s2162_s26, 4  ;;  %s426_s30 = int_to_ptr.vmem [resolvable:$true] %s425_s30 }
  0x1c   : > { %s2163_s27 = smov [#allocation6]   ;;  %s2018_s22 = scalar_lea.hbm %s2648_s5, 16 }
  0x1d   : > { %s439_s24 = sshll.u32 %s2163_s27, 4  ;;  %p2324_p13 = pnand %p2316_p11, %p1909_p12  ;;  %s2328_s24 = int_to_ptr.vmem [resolvable:$true] %s439_s24 }
  0x1e   : > { %p2019_p0 = scmp.ne.s32.totalorder %s2648_s5, %s2018_s22  ;;  %p2025_p5 = scmp.lt.u32.totalorder %s2018_s22, %s2648_s5 }
  0x1f   : > { %p2020_p1 = pneg %p2324_p13 }
  0x21   : > { %p2021_p2 = pnand %p2020_p1, %p2019_p0 }
  0x23   : > { %p2022_p3 = pneg %p2021_p2 }
  0x25   : > { %p2027_p6 = pnand %p2025_p5, %p2022_p3 }
  0x27   : > { %2030 = shalt.err (!%p2027_p6)
}
  0x28   : > { %s2031_s25 = scalar_lea.vmem %s426_s30, 16  ;;  %s2038_s20 = scalar_lea.vmem %s426_s30, 32 }
  0x29   : > { %p2032_p7 = scmp.ne.s32.totalorder %s426_s30, %s2031_s25  ;;  %p2039_p8 = scmp.lt.s32.totalorder %s426_s30, %s426_s30 }
  0x2a   : > { %p2040_p4 = scmp.lt.s32.totalorder %s2038_s20, %s2031_s25 }
  0x2b   : > { %p2034_p9 = pnand %p2032_p7, %p2020_p1 }
  0x2c   : > { %p2041_p11 = por %p2040_p4, %p2039_p8 }
  0x2d   : > { %p2035_p12 = pneg %p2034_p9 }
  0x2f   : > { %p2042_p10 = pnand %p2041_p11, %p2035_p12 }
  0x31   : > { %2045 = shalt.err (!%p2042_p10)
}
  0x32   : > { %1912 = dma.hbm_to_vmem [thread:$0]  (!%p2324_p13), %s2648_s5, 16, %s426_s30, [#allocation4]  }
  0x33   : > { %s2046_s27 = scalar_lea.hbm %s2650_s7, 16 }
  0x34   : > { %p2047_p0 = scmp.ne.s32.totalorder %s2650_s7, %s2046_s27  ;;  %p2053_p10 = scmp.lt.u32.totalorder %s2046_s27, %s2650_s7 }
  0x36   : > { %p2049_p4 = pnand %p2047_p0, %p2020_p1 }
  0x38   : > { %p2050_p8 = pneg %p2049_p4 }
  0x3a   : > { %p2055_p11 = pnand %p2053_p10, %p2050_p8 }
  0x3c   : > { %2058 = shalt.err (!%p2055_p11)
}
  0x3d   : > { %s2059_s30 = scalar_lea.vmem %s2328_s24, 16  ;;  %s2066_s15 = scalar_lea.vmem %s2328_s24, 32 }
  0x3e   : > { %p2060_p2 = scmp.ne.s32.totalorder %s2328_s24, %s2059_s30  ;;  %p2067_p6 = scmp.lt.s32.totalorder %s2328_s24, %s2328_s24 }
  0x3f   : > { %p2068_p7 = scmp.lt.s32.totalorder %s2066_s15, %s2059_s30 }
  0x40   : > { %p2062_p3 = pnand %p2060_p2, %p2020_p1 }
  0x41   : > { %p2069_p9 = por %p2068_p7, %p2067_p6 }
  0x42   : > { %p2063_p5 = pneg %p2062_p3 }
  0x44   : > { %p2070_p12 = pnand %p2069_p9, %p2063_p5 }
  0x46   : > { %2073 = shalt.err (!%p2070_p12)
}
  0x47   : > { %1915 = dma.hbm_to_vmem [thread:$0]  (!%p2324_p13), %s2650_s7, 16, %s2328_s24, [#allocation7]  }
  0x48   : > { %p2684_p0 = scmp.ne.s32.totalorder %s2681_s18, 0 }
  0x49   : > { %p2685_p1 = scmp.ne.s32.totalorder (!%p2684_p0), %s2682_s19, 0 }
  0x4a   : > { %490 = sbr.rel (%p2684_p0) target bundleno = 3045 (0xbe5), region = 80 }
  0x51   : > { %2127 = dma.done.wait (%p2685_p1), [#allocation4], 16  }
  0x52   : > { %2129 = vsyncadd (%p2685_p1), [#allocation4], 4294967280 }
  0x53   : > { %2131 = dma.done.wait (%p2685_p1), [#allocation7], 16  }
  0x54   : > { %2133 = vsyncadd (%p2685_p1), [#allocation7], 4294967280  ;;  %p548_p4 = scmp.lt.s32.totalorder %s2152_s23, 1  ;;  %vm564_vm0 = vcmask 261120   ;;  %v1984_v14 = vld [vmem:[%s2647_s4] sm:$0xff]   ;;  %v2164_v15 = vmov 0.0  }
  0x55   : > { %1783 = vmatprep.subr.bf16.mxu0 %v2164_v15  ;;  %1805 = vmatprep.subr.bf16.mxu1 %v2164_v15  ;;  %v1985_v16 = vld [vmem:[%s2647_s4 + $0x8] sm:$0xff]   ;;  %vm2165_vm1 = vmmov 0   ;;  %v1701_v24 = vld [vmem:[%s2645_s2] ss:$0 sm:$0xff]  ;;  %v1707_v45 = vld [vmem:[#allocation6] ss:$0 sm:$0xff] }
  0x56   : > { %s549_s28 = scalar_select %p548_p4, %s2152_s23, 1  ;;  %1784 = vmatpush3.bf16.msra.mxu0 %v1984_v14  ;;  %1787 = vmatprep.mubr.msk.bf16.mxu0 %vm2165_vm1, %v2164_v15  ;;  %v1702_v26 = vld [vmem:[%s2646_s3] ss:$0 sm:$0xff]  ;;  %v1987_v34 = vld [vmem:[%s2649_s6 + $0x8] sm:$0xff]   ;;  %vm745_vm2 = vcmask 64512   ;;  %vm810_vm3 = vcmask 1043456  }
  0x57   : > { %1785 = vmatprep.subr.bf16.mxu0 %v2164_v15  ;;  %1807 = vmatprep.mubr.msk.bf16.mxu1 %vm2165_vm1, %v2164_v15  ;;  %v1986_v31 = vld [vmem:[%s2649_s6] sm:$0xff]   ;;  %s2166_s26 = smov 120   ;;  %s2168_s19 = smov 88  }
  0x58   : > { %s1699_s24 = sshll.u32 %s549_s28, 3  ;;  %v1703_v37 = vld [vmem:[#allocation3] ss:$0 sm:$0xff]  ;;  %s2169_s20 = smov 112  }
  0x59   : > { %s554_s14 = scalar_lea.vmem %s2643_s0, %s1699_s24  ;;  %s558_s25 = scalar_lea.vmem %s2644_s1, %s1699_s24 }
  0x5a   : > { %v2396_v0 = vld [vmem:[%s554_s14] sm:$0xff]  ;;  %1786 = vmatpush3.bf16.msra.mxu0 %v1985_v16  ;;  %s2170_s28 = smov 80   ;;  %s2171_s24 = smov 104  }
  0x5b   : > { %v561_v1 = vld [vmem:[%s558_s25] sm:$0xff]  ;;  %v565_v2 = vsel %vm564_vm0, %v2396_v0, 0.0  ;;  %1791 = vmatprep.subr.bf16.mxu0 %v2164_v15  ;;  %s2167_s25 = smov 96   ;;  %s2172_s14 = smov 72  }
  0x5c   : > { %v594_v3 = vsel %vm564_vm0, %v561_v1, 0.0  ;;  %566 = vadd.xlane.f32.xlu0 %v565_v2  ;;  %s545_s22 = sand.u32 1, %s2144_s21   ;;  %s2686_s17 = sld [smem:[#allocation19_spill]] }
  0x5d   : > { %s1698_s27 = sshll.u32 %s545_s22, 3  ;;  %p2687_p8 = scmp.ne.s32.totalorder %s2677_s29, 0 }
  0x5e   : > { %s2173_s18 = smov [#allocation8]  }
  0x60   : > { %595 = vadd.xlane.f32.xlu0 %v594_v3 }
  0xe9   : > { %v567_v4 = vpop.xlane.xlu0 %566 }
  0xea   : > { %v569_v5 = vmul.f32 0.03125, %v567_v4 }
  0xec   : > { %v570_v6 = vsub.f32 %v2396_v0, %v569_v5 }
  0xed   : > { %v596_v7 = vpop.xlane.xlu0 %595 }
  0xee   : > { %v597_v8 = vmul.f32 0.03125, %v596_v7  ;;  %v571_v9 = vmul.f32 %v570_v6, %v570_v6 }
  0xf0   : > { %v598_v10 = vsub.f32 %v561_v1, %v597_v8  ;;  %v572_v11 = vsel %vm564_vm0, %v571_v9, 0.0 }
  0xf1   : > { %573 = vadd.xlane.f32.xlu1 %v572_v11 }
  0xf2   : > { %v599_v12 = vmul.f32 %v598_v10, %v598_v10 }
  0xf4   : > { %v600_v13 = vsel %vm564_vm0, %v599_v12, 0.0 }
  0xf5   : > { %601 = vadd.xlane.f32.xlu1 %v600_v13 }
 0x17e   : > { %v574_v17 = vpop.xlane.xlu1 %573 }
 0x17f   : > { %v575_v18 = vmul.f32 0.03125, %v574_v17 }
 0x181   : > { %v576_v19 = vadd.f32 1e-06, %v575_v18 }
 0x182   : > { %v602_v20 = vpop.xlane.xlu1 %601 }
 0x183   : > { %1998 = vrsqrt.f32 %v576_v19  ;;  %v603_v21 = vmul.f32 0.03125, %v602_v20  ;;  %v968_v20 = vld [vmem:[%s2651_s8 + $0x4] sm:$0xf] }
 0x185   : > { %v604_v22 = vadd.f32 1e-06, %v603_v21  ;;  %v973_v21 = vsel %vm810_vm3, %v968_v20, 0 }
 0x187   : > { %2000 = vrsqrt.f32 %v604_v22 }
 0x18d   : > { %v1999_v23 = vpop.eup %1998 }
 0x18e   : > { %v578_v25 = vmul.f32 %v1999_v23, %v570_v6 }
 0x190   : > { %v585_v27 = vmul.f32 %v1701_v24, %v578_v25 }
 0x191   : > { %v2001_v28 = vpop.eup %2000 }
 0x192   : > { %v606_v29 = vmul.f32 %v2001_v28, %v598_v10  ;;  %v592_v30 = vadd.f32 %v1702_v26, %v585_v27 }
 0x194   : > { %v2427_v32 = vpack.c.bf16 %v592_v30, %v592_v30  ;;  %v607_v33 = vmul.f32 %v1701_v24, %v606_v29 }
 0x196   : > { %1788 = vmatmul.mubr.msk.bf16.vlgmr.msra.gmra.mrb[0].mxu0 %vm564_vm0, %v2427_v32  ;;  %v608_v35 = vadd.f32 %v1702_v26, %v607_v33  ;;  %v855_v26 = vld [vmem:[%s2651_s8] sm:$0xf] }
 0x197   : > { %1792 = vmatpush3.bf16.msra.mxu0 %v1986_v31  ;;  %1795 = vmatprep.mubr.msk.bf16.mxu0 %vm2165_vm1, %v2164_v15  ;;  %v1019_v29 = vsel %vm810_vm3, %v855_v26, 0 }
 0x198   : > { %1793 = vmatprep.subr.bf16.mxu0 %v2164_v15  ;;  %v609_v36 = vpack.c.bf16 %v608_v35, %v608_v35 }
 0x19b   : > { %1794 = vmatpush3.bf16.msra.mxu0 %v1987_v34 }
 0x19c   : > { %1799 = vmatprep.subr.bf16.mxu0 %v2164_v15 }
 0x19e   : > { %1796 = vmatmul.mubr.msk.bf16.vlgmr.msra.gmra.mrb[4].mxu0 %vm564_vm0, %v609_v36 }
 0x19f   : > { %1801 = vmatprep.mubr.msk.bf16.mxu0 %vm2165_vm1, %v2164_v15 }
 0x269   : > { %v670_v38 = vpop.f32.mrb[0].mxu0 }
 0x26a   : > { %v671_v39 = vadd.f32 %v1703_v37, %v670_v38  ;;  %v1789_v40 = vpop.f32.mrb[1].mxu0 }
 0x26b   : > { %v673_v41 = vpop.f32.mrb[2].mxu0 }
 0x26c   : > { %v676_v42 = vmul.f32 0.35355338, %v671_v39  ;;  %v1790_v43 = vpop.f32.mrb[3].mxu0 }
 0x26e   : > { %v2441_v44 = vpack.c.bf16 %v676_v42, %v676_v42 }
 0x270   : > { %857 = vrot.lane.b32.xlu1 %v2441_v44, %s2166_s26 }
 0x271   : > { %v738_v46 = vpop.f32.mrb[4].mxu0 }
 0x272   : > { %v739_v47 = vadd.f32 %v1707_v45, %v738_v46  ;;  %v1797_v48 = vpop.f32.mrb[5].mxu0 }
 0x273   : > { %v741_v49 = vpop.f32.mrb[6].mxu0 }
 0x274   : > { %v2444_v50 = vpack.c.bf16 %v739_v47, %v739_v47  ;;  %v1798_v51 = vpop.f32.mrb[7].mxu0 }
 0x276   : > { %859 = vrot.lane.b32.xlu0 %v2444_v50, %s2166_s26  ;;  %v750_v52 = vsel %vm745_vm2, %v2444_v50, 0 }
 0x277   : > { %1800 = vmatpush3.bf16.xpose.msra.mxu0 %v750_v52 }
 0x278   : > { %1811 = vmatprep.subr.bf16.mxu0 %v2164_v15 }
 0x27e   : > { %1802 = vmatmul.mubr.msk.bf16.vlgmr.msra.gmra.mrb[8].mxu0 %vm745_vm2, %v2441_v44 }
 0x27f   : > { %1813 = vmatprep.mubr.msk.bf16.mxu0 %vm2165_vm1, %v2164_v15 }
 0x2e2   : > { %v858_v55 = vpop.permute.xlu1 %857 }
 0x2e8   : > { %v860_v53 = vpop.permute.xlu0 %859 }
 0x2e9   : > { %v865_v54 = vsel %vm745_vm2, %v860_v53, 0 }
 0x2ea   : > { %1812 = vmatpush3.bf16.xpose.msra.mxu0 %v865_v54 }
 0x2eb   : > { %1823 = vmatprep.subr.bf16.mxu0 %v2164_v15 }
 0x2f1   : > { %1814 = vmatmul.mubr.msk.bf16.vlgmr.msra.gmra.mrb[12].mxu0 %vm745_vm2, %v858_v55 }
 0x2f2   : > { %1825 = vmatprep.mubr.msk.bf16.mxu0 %vm2165_vm1, %v2164_v15  ;;  %1824 = vmatpush3.bf16.msra.mxu0 %v973_v21 }
 0x2f3   : > { %1835 = vmatprep.subr.bf16.mxu0 %v2164_v15 }
 0x351   : > { %v786_v56 = vpop.f32.mrb[8].mxu0 }
 0x352   : > { %v1803_v57 = vpop.f32.mrb[9].mxu0  ;;  %v792_v58 = vsel %vm745_vm2, %v786_v56, -inf }
 0x353   : > { %793 = vmax.xlane.f32.xlu1 %v792_v58  ;;  %v789_v59 = vpop.f32.mrb[10].mxu0 }
 0x354   : > { %v1804_v60 = vpop.f32.mrb[11].mxu0 }
 0x3c4   : > { %v901_v61 = vpop.f32.mrb[12].mxu0 }
 0x3c5   : > { %v1815_v62 = vpop.f32.mrb[13].mxu0  ;;  %v907_v63 = vsel %vm745_vm2, %v901_v61, -inf }
 0x3c6   : > { %908 = vmax.xlane.f32.xlu0 %v907_v63  ;;  %v904_v1 = vpop.f32.mrb[14].mxu0 }
 0x3c7   : > { %v1816_v2 = vpop.f32.mrb[15].mxu0 }
 0x3e0   : > { %v794_v3 = vpop.xlane.xlu1 %793 }
 0x3e1   : > { %v795_v4 = vsub.f32 %v786_v56, %v794_v3 }
 0x3e3   : > { %v796_v5 = vmul.f32 1.442695, %v795_v4 }
 0x3e5   : > { %2002 = vpow2.f32 %v796_v5 }
 0x3ef   : > { %v2003_v6 = vpop.eup %2002 }
 0x3f0   : > { %v798_v7 = vsel %vm745_vm2, %v2003_v6, 0.0 }
 0x3f1   : > { %799 = vadd.xlane.f32.xlu0 %v798_v7 }
 0x407   : > { %805 = vrot.lane.b32.xlu0 %v2444_v50, %s2167_s25 }
 0x453   : > { %v909_v8 = vpop.xlane.xlu0 %908 }
 0x454   : > { %v910_v9 = vsub.f32 %v901_v61, %v909_v8 }
 0x456   : > { %v911_v10 = vmul.f32 1.442695, %v910_v9 }
 0x458   : > { %2004 = vpow2.f32 %v911_v10  ;;  %v1172_v10 = vld [vmem:[%s2651_s8 + $0x8] sm:$0xf] }
 0x462   : > { %v2005_v11 = vpop.eup %2004 }
 0x463   : > { %v913_v12 = vsel %vm745_vm2, %v2005_v11, 0.0 }
 0x464   : > { %914 = vadd.xlane.f32.xlu1 %v913_v12 }
 0x475   : > { %919 = vrot.lane.b32.xlu1 %v2444_v50, %s2168_s19  ;;  %s1738_s19 = sshll.u32 %s2152_s23, 7  ;;  %s1570_s23 = scalar_lea.sflag [#allocation5], %s545_s22 }
 0x479   : > { %1063 = vrot.lane.b32.xlu1 %v2444_v50, %s2169_s20 }
 0x47d   : > { %1061 = vrot.lane.b32.xlu1 %v2441_v44, %s2169_s20  ;;  %s547_s20 = scalar_lea.vmem [#allocation8], %s1698_s27 }
 0x47e   : > { %v800_v13 = vpop.xlane.xlu0 %799  ;;  %s1584_s30 = sshll.u32 %s547_s20, 4  ;;  %s2597_s30 = int_to_ptr.vmem [resolvable:$true] %s1584_s30 }
 0x47f   : > { %2006 = vrcp.f32 %v800_v13 }
 0x482   : > { %v806_v14 = vpop.permute.xlu0 %805 }
 0x483   : > { %v812_v16 = vsel %vm810_vm3, %v806_v14, 0 }
 0x484   : > { %1806 = vmatpush3.bf16.msra.mxu1 %v812_v16 }
 0x485   : > { %1817 = vmatprep.subr.bf16.mxu1 %v2164_v15 }
 0x489   : > { %v2007_v17 = vpop.eup %2006 }
 0x48a   : > { %v802_v18 = vmul.f32 %v2007_v17, %v2003_v6 }
 0x48c   : > { %v803_v19 = vpack.c.bf16 %v802_v18, %v802_v18 }
 0x48e   : > { %1808 = vmatmul.mubr.msk.bf16.vlgmr.msra.gmra.mrb[0].mxu1 %vm745_vm2, %v803_v19 }
 0x48f   : > { %1819 = vmatprep.mubr.msk.bf16.mxu1 %vm2165_vm1, %v2164_v15 }
 0x4f1   : > { %v915_v22 = vpop.xlane.xlu1 %914 }
 0x4f2   : > { %2008 = vrcp.f32 %v915_v22 }
 0x4f5   : > { %v920_v23 = vpop.permute.xlu1 %919 }
 0x4f6   : > { %v925_v24 = vsel %vm810_vm3, %v920_v23, 0 }
 0x4f7   : > { %1818 = vmatpush3.bf16.msra.mxu1 %v925_v24 }
 0x4f8   : > { %1829 = vmatprep.subr.bf16.mxu1 %v2164_v15 }
 0x4f9   : > { %v1064_v36 = vpop.permute.xlu1 %1063 }
 0x4fa   : > { %v1069_v41 = vsel %vm745_vm2, %v1064_v36, 0 }
 0x4fc   : > { %v2009_v25 = vpop.eup %2008 }
 0x4fd   : > { %v917_v27 = vmul.f32 %v2009_v25, %v2005_v11  ;;  %v1062_v43 = vpop.permute.xlu1 %1061  ;;  %v1177_v11 = vsel %vm810_vm3, %v1172_v10, 0 }
 0x4ff   : > { %v918_v28 = vpack.c.bf16 %v917_v27, %v917_v27 }
 0x501   : > { %1820 = vmatmul.mubr.msk.bf16.vlgmr.msra.gmra.mrb[4].mxu1 %vm745_vm2, %v918_v28  ;;  %v1331_v28 = vld [vmem:[%s2651_s8 + $0xc] sm:$0xf] }
 0x502   : > { %1830 = vmatpush3.bf16.msra.mxu1 %v1019_v29  ;;  %1831 = vmatprep.mubr.msk.bf16.mxu1 %vm2165_vm1, %v2164_v15  ;;  %v1336_v29 = vsel %vm810_vm3, %v1331_v28, 0 }
 0x503   : > { %1841 = vmatprep.subr.bf16.mxu1 %v2164_v15 }
 0x561   : > { %v848_v30 = vpop.f32.mrb[0].mxu1 }
 0x562   : > { %v854_v31 = vpack.c.bf16 %v848_v30, %v848_v30  ;;  %v1809_v33 = vpop.f32.mrb[1].mxu1 }
 0x563   : > { %v851_v34 = vpop.f32.mrb[2].mxu1 }
 0x564   : > { %v1810_v35 = vpop.f32.mrb[3].mxu1  ;;  %1832 = vmatmul.mubr.msk.bf16.vlgmr.msra.gmra.mrb[8].mxu1 %vm745_vm2, %v854_v31 }
 0x565   : > { %1843 = vmatprep.mubr.msk.bf16.mxu1 %vm2165_vm1, %v2164_v15 }
 0x5d4   : > { %v961_v37 = vpop.f32.mrb[4].mxu1 }
 0x5d5   : > { %v967_v38 = vpack.c.bf16 %v961_v37, %v961_v37  ;;  %v1821_v39 = vpop.f32.mrb[5].mxu1 }
 0x5d6   : > { %v964_v40 = vpop.f32.mrb[6].mxu1 }
 0x5d7   : > { %v1822_v42 = vpop.f32.mrb[7].mxu1  ;;  %1826 = vmatmul.mubr.msk.bf16.vlgmr.msra.gmra.mrb[16].mxu0 %vm745_vm2, %v967_v38  ;;  %v1988_v40 = vld [vmem:[%s2653_s10] sm:$0xff]  }
 0x5d8   : > { %1836 = vmatpush3.bf16.xpose.msra.mxu0 %v1069_v41  ;;  %1837 = vmatprep.mubr.msk.bf16.mxu0 %vm2165_vm1, %v2164_v15  ;;  %v1989_v42 = vld [vmem:[%s2653_s10 + $0x8] sm:$0xff]  }
 0x5d9   : > { %1847 = vmatprep.subr.bf16.mxu0 %v2164_v15 }
 0x5df   : > { %1838 = vmatmul.mubr.msk.bf16.vlgmr.msra.gmra.mrb[20].mxu0 %vm745_vm2, %v1062_v43 }
 0x5e0   : > { %1849 = vmatprep.mubr.msk.bf16.mxu0 %vm2165_vm1, %v2164_v15  ;;  %1848 = vmatpush3.bf16.msra.mxu0 %v1177_v11 }
 0x5e1   : > { %1859 = vmatprep.subr.bf16.mxu0 %v2164_v15 }
 0x637   : > { %v1055_v45 = vpop.f32.mrb[8].mxu1 }
 0x638   : > { %v1833_v46 = vpop.f32.mrb[9].mxu1 }
 0x639   : > { %v1058_v47 = vpop.f32.mrb[10].mxu1 }
 0x63a   : > { %v1834_v48 = vpop.f32.mrb[11].mxu1 }
 0x6aa   : > { %v1009_v49 = vpop.f32.mrb[16].mxu0 }
 0x6ab   : > { %v2498_v51 = vadd.f32 %v1055_v45, %v1009_v49  ;;  %v1827_v52 = vpop.f32.mrb[17].mxu0  ;;  %v1990_v45 = vld [vmem:[%s2655_s12] sm:$0xff]  }
 0x6ac   : > { %v1012_v53 = vpop.f32.mrb[18].mxu0  ;;  %v1992_v52 = vld [vmem:[%s2655_s12 + $0x10] sm:$0xff]  }
 0x6ad   : > { %v1828_v54 = vpop.f32.mrb[19].mxu0 }
 0x6b2   : > { %v1105_v55 = vpop.f32.mrb[20].mxu0 }
 0x6b3   : > { %v1839_v56 = vpop.f32.mrb[21].mxu0  ;;  %v1111_v57 = vsel %vm745_vm2, %v1105_v55, -inf }
 0x6b4   : > { %1112 = vmax.xlane.f32.xlu0 %v1111_v57  ;;  %v1108_v58 = vpop.f32.mrb[22].mxu0  ;;  %v1993_v56 = vld [vmem:[%s2655_s12 + $0x18] sm:$0xff]   ;;  %v1994_v57 = vld [vmem:[%s2655_s12 + $0x20] sm:$0xff]  }
 0x6b5   : > { %v1840_v59 = vpop.f32.mrb[23].mxu0  ;;  %v1995_v58 = vld [vmem:[%s2655_s12 + $0x28] sm:$0xff]  }
 0x6b6   : > { %v1724_v59 = vld [vmem:[%s2654_s11] ss:$0 sm:$0xff] }
 0x6ca   : > { %1123 = vrot.lane.b32.xlu0 %v2444_v50, %s2170_s28  ;;  %s2595_s28 = scalar_lea.hbm %s2686_s17, %s1738_s19 }
 0x6ce   : > { %1220 = vrot.lane.b32.xlu0 %v2441_v44, %s2171_s24 }
 0x741   : > { %v1113_v60 = vpop.xlane.xlu0 %1112 }
 0x742   : > { %v1114_v61 = vsub.f32 %v1105_v55, %v1113_v60  ;;  %v1996_v60 = vld [vmem:[%s2655_s12 + $0x30] sm:$0xff]  }
 0x744   : > { %v1115_v62 = vmul.f32 1.442695, %v1114_v61 }
 0x745   : > { %v1124_v63 = vpop.permute.xlu0 %1123 }
 0x746   : > { %2010 = vpow2.f32 %v1115_v62  ;;  %v1129_v1 = vsel %vm810_vm3, %v1124_v63, 0  ;;  %v1997_v62 = vld [vmem:[%s2655_s12 + $0x38] sm:$0xff]  }
 0x747   : > { %1842 = vmatpush3.bf16.msra.mxu1 %v1129_v1 }
 0x748   : > { %1853 = vmatprep.subr.bf16.mxu1 %v2164_v15 }
 0x749   : > { %v1221_v9 = vpop.permute.xlu0 %1220 }
 0x750   : > { %v2011_v2 = vpop.eup %2010 }
 0x751   : > { %v1117_v3 = vsel %vm745_vm2, %v2011_v2, 0.0 }
 0x752   : > { %1118 = vadd.xlane.f32.xlu1 %v1117_v3 }
 0x763   : > { %1222 = vrot.lane.b32.xlu1 %v2444_v50, %s2171_s24  ;;  %s1563_s24 = sld [smem:[#allocation2]] }
 0x7df   : > { %v1119_v4 = vpop.xlane.xlu1 %1118 }
 0x7e0   : > { %2012 = vrcp.f32 %v1119_v4 }
 0x7e3   : > { %v1223_v6 = vpop.permute.xlu1 %1222 }
 0x7e4   : > { %v1228_v8 = vsel %vm745_vm2, %v1223_v6, 0  ;;  %v1723_v6 = vld [vmem:[%s2652_s9] ss:$0 sm:$0xff] }
 0x7ea   : > { %v2013_v5 = vpop.eup %2012 }
 0x7eb   : > { %v1121_v44 = vmul.f32 %v2013_v5, %v2011_v2 }
 0x7ed   : > { %v1122_v7 = vpack.c.bf16 %v1121_v44, %v1121_v44 }
 0x7ef   : > { %1844 = vmatmul.mubr.msk.bf16.vlgmr.msra.gmra.mrb[12].mxu1 %vm745_vm2, %v1122_v7 }
 0x7f0   : > { %1854 = vmatpush3.bf16.xpose.msra.mxu1 %v1228_v8  ;;  %1855 = vmatprep.mubr.msk.bf16.mxu1 %vm2165_vm1, %v2164_v15 }
 0x7f1   : > { %1865 = vmatprep.subr.bf16.mxu1 %v2164_v15 }
 0x7f7   : > { %1856 = vmatmul.mubr.msk.bf16.vlgmr.msra.gmra.mrb[16].mxu1 %vm745_vm2, %v1221_v9  ;;  %v1564_v9 = vstv %s1563_s24  ;;  %s2074_s24 = scalar_lea.vmem %s2597_s30, 128 }
 0x7f8   : > { %1867 = vmatprep.mubr.msk.bf16.mxu1 %vm2165_vm1, %v2164_v15  ;;  %1866 = vmatpush3.bf16.msra.mxu1 %v1336_v29  ;;  %p2075_p13 = scmp.ne.s32.totalorder %s2597_s30, %s2074_s24 }
 0x7f9   : > { %1879 = vmatprep.subr.bf16.mxu1 %v2164_v15 }
 0x7fa   : > { %p2076_p10 = pnand %p2075_p13, %p2687_p8 }
 0x7fc   : > { %p2077_p11 = pneg %p2076_p10 }
 0x8c2   : > { %v1165_v12 = vpop.f32.mrb[12].mxu1 }
 0x8c3   : > { %v1171_v13 = vpack.c.bf16 %v1165_v12, %v1165_v12  ;;  %v1845_v14 = vpop.f32.mrb[13].mxu1 }
 0x8c4   : > { %v1168_v16 = vpop.f32.mrb[14].mxu1 }
 0x8c5   : > { %v1846_v17 = vpop.f32.mrb[15].mxu1  ;;  %1850 = vmatmul.mubr.msk.bf16.vlgmr.msra.gmra.mrb[24].mxu0 %vm745_vm2, %v1171_v13 }
 0x8c6   : > { %1861 = vmatprep.mubr.msk.bf16.mxu0 %vm2165_vm1, %v2164_v15 }
 0x8ca   : > { %v1264_v18 = vpop.f32.mrb[16].mxu1 }
 0x8cb   : > { %v1857_v19 = vpop.f32.mrb[17].mxu1  ;;  %v1270_v20 = vsel %vm745_vm2, %v1264_v18, -inf }
 0x8cc   : > { %1271 = vmax.xlane.f32.xlu1 %v1270_v20  ;;  %v1267_v21 = vpop.f32.mrb[18].mxu1 }
 0x8cd   : > { %v1858_v22 = vpop.f32.mrb[19].mxu1 }
 0x959   : > { %v1272_v23 = vpop.xlane.xlu1 %1271 }
 0x95a   : > { %v1273_v24 = vsub.f32 %v1264_v18, %v1272_v23 }
 0x95c   : > { %v1274_v25 = vmul.f32 1.442695, %v1273_v24 }
 0x95e   : > { %2014 = vpow2.f32 %v1274_v25 }
 0x968   : > { %v2015_v26 = vpop.eup %2014 }
 0x969   : > { %v1276_v27 = vsel %vm745_vm2, %v2015_v26, 0.0 }
 0x96a   : > { %1277 = vadd.xlane.f32.xlu0 %v1276_v27 }
 0x980   : > { %1282 = vrot.lane.b32.xlu0 %v2444_v50, %s2172_s14  ;;  %s2078_s14 = sshll.u32 %s2173_s18, 4  ;;  %s2079_s14 = int_to_ptr.vmem [resolvable:$false] %s2078_s14 }
 0x981   : > { %s2080_s27 = scalar_lea.vmem %s2079_s14, 256  ;;  %p2081_p2 = scmp.lt.s32.totalorder %s2597_s30, %s2079_s14 }
 0x982   : > { %p2082_p3 = scmp.lt.s32.totalorder %s2080_s27, %s2074_s24 }
 0x984   : > { %p2083_p5 = por %p2082_p3, %p2081_p2 }
 0x986   : > { %p2084_p6 = pnand %p2083_p5, %p2077_p11 }
 0x998   : > { %v1213_v30 = vpop.f32.mrb[24].mxu0 }
 0x999   : > { %v1219_v31 = vadd.f32 %v1213_v30, %v2498_v51  ;;  %v1851_v33 = vpop.f32.mrb[25].mxu0  ;;  %v1991_v51 = vld [vmem:[%s2655_s12 + $0x8] sm:$0xff]  }
 0x99a   : > { %v1216_v34 = vpop.f32.mrb[26].mxu0 }
 0x99b   : > { %v1852_v35 = vpop.f32.mrb[27].mxu0 }
 0x9f7   : > { %v1278_v36 = vpop.xlane.xlu0 %1277 }
 0x9f8   : > { %2016 = vrcp.f32 %v1278_v36 }
 0x9fb   : > { %v1283_v37 = vpop.permute.xlu0 %1282 }
 0x9fc   : > { %v1288_v50 = vsel %vm810_vm3, %v1283_v37, 0 }
 0x9fd   : > { %1860 = vmatpush3.bf16.msra.mxu0 %v1288_v50 }
 0x9fe   : > { %1871 = vmatprep.subr.bf16.mxu0 %v2164_v15 }
 0xa02   : > { %v2017_v38 = vpop.eup %2016 }
 0xa03   : > { %v1280_v39 = vmul.f32 %v2017_v38, %v2015_v26 }
 0xa05   : > { %v1281_v41 = vpack.c.bf16 %v1280_v39, %v1280_v39 }
 0xa07   : > { %1862 = vmatmul.mubr.msk.bf16.vlgmr.msra.gmra.mrb[28].mxu0 %vm745_vm2, %v1281_v41 }
 0xa08   : > { %1872 = vmatpush3.bf16.msra.mxu0 %v1988_v40  ;;  %1875 = vmatprep.mubr.msk.bf16.mxu0 %vm2165_vm1, %v2164_v15 }
 0xa09   : > { %1873 = vmatprep.subr.bf16.mxu0 %v2164_v15 }
 0xa0c   : > { %1874 = vmatpush3.bf16.msra.mxu0 %v1989_v42 }
 0xa0f   : > { %1876 = vmatmul.mubr.msk.bf16.vlgmr.msra.gmra.mrb[32].mxu0 %vm564_vm0, %v2427_v32 }
 0xada   : > { %v1324_v43 = vpop.f32.mrb[28].mxu0 }
 0xadb   : > { %v1330_v46 = vpack.c.bf16 %v1324_v43, %v1324_v43  ;;  %v1863_v47 = vpop.f32.mrb[29].mxu0 }
 0xadc   : > { %v1327_v48 = vpop.f32.mrb[30].mxu0 }
 0xadd   : > { %v1864_v49 = vpop.f32.mrb[31].mxu0  ;;  %1868 = vmatmul.mubr.msk.bf16.vlgmr.msra.gmra.mrb[20].mxu1 %vm745_vm2, %v1330_v46 }
 0xade   : > { %1880 = vmatpush3.bf16.msra.mxu1 %v1990_v45  ;;  %1895 = vmatprep.mubr.msk.bf16.mxu1 %vm2165_vm1, %v2164_v15 }
 0xadf   : > { %1881 = vmatprep.subr.bf16.mxu1 %v2164_v15 }
 0xae2   : > { %1882 = vmatpush3.bf16.msra.mxu1 %v1991_v51  ;;  %v1444_v32 = vpop.f32.mrb[32].mxu0 }
 0xae3   : > { %v1877_v53 = vpop.f32.mrb[33].mxu0  ;;  %1883 = vmatprep.subr.bf16.mxu1 %v2164_v15  ;;  %v1445_v61 = vadd.f32 %v1724_v59, %v1444_v32 }
 0xae4   : > { %v1447_v54 = vpop.f32.mrb[34].mxu0 }
 0xae5   : > { %v1878_v55 = vpop.f32.mrb[35].mxu0  ;;  %v1450_v63 = vmax.f32 %v1445_v61, 0.0 }
 0xae6   : > { %1884 = vmatpush3.bf16.msra.mxu1 %v1992_v52 }
 0xae7   : > { %1885 = vmatprep.subr.bf16.mxu1 %v2164_v15  ;;  %v1451_v1 = vpack.c.bf16 %v1450_v63, %v1450_v63 }
 0xaea   : > { %1886 = vmatpush3.bf16.msra.mxu1 %v1993_v56 }
 0xaeb   : > { %1887 = vmatprep.subr.bf16.mxu1 %v2164_v15 }
 0xaee   : > { %1888 = vmatpush3.bf16.msra.mxu1 %v1994_v57 }
 0xaef   : > { %1889 = vmatprep.subr.bf16.mxu1 %v2164_v15 }
 0xaf2   : > { %1890 = vmatpush3.bf16.msra.mxu1 %v1995_v58 }
 0xaf3   : > { %1891 = vmatprep.subr.bf16.mxu1 %v2164_v15 }
 0xaf6   : > { %1892 = vmatpush3.bf16.msra.mxu1 %v1996_v60 }
 0xaf7   : > { %1893 = vmatprep.subr.bf16.mxu1 %v2164_v15  ;;  %v1728_v15 = vld [vmem:[%s2656_s13] ss:$0 sm:$0xff] }
 0xafa   : > { %1894 = vmatpush3.bf16.msra.mxu1 %v1997_v62 }
 0xafd   : > { %1896 = vmatmul.mubr.bf16.vlgmr.msra.gmra.mrb[24].mxu1 %v1451_v1 }
 0xbb0   : > { %v1372_v2 = vpop.f32.mrb[20].mxu1 }
 0xbb1   : > { %v1378_v3 = vadd.f32 %v1372_v2, %v1219_v31  ;;  %v1869_v4 = vpop.f32.mrb[21].mxu1 }
 0xbb2   : > { %v1375_v5 = vpop.f32.mrb[22].mxu1 }
 0xbb3   : > { %v1870_v44 = vpop.f32.mrb[23].mxu1  ;;  %v1386_v7 = vadd.f32 %v1723_v6, %v1378_v3 }
 0xbb5   : > { %v1566_v13 = vadd.f32 %v1386_v7, %v2396_v0 }
 0xbd0   : > { %v1557_v8 = vpop.f32.mrb[24].mxu1 }
 0xbd1   : > { %v1558_v10 = vadd.f32 %v1728_v15, %v1557_v8  ;;  %v1897_v11 = vpop.f32.mrb[25].mxu1 }
 0xbd2   : > { %v1560_v12 = vpop.f32.mrb[26].mxu1 }
 0xbd3   : > { %v1565_v14 = vmul.f32 %v1564_v9, %v1558_v10  ;;  %v1898_v16 = vpop.f32.mrb[27].mxu1 }
 0xbd5   : > { %v1567_v17 = vadd.f32 %v1566_v13, %v1565_v14 }
 0xbd7   : > { %1568 = vst.msk [vmem:[%s547_s20] sm:$0xff] %vm564_vm0, %v1567_v17 }
 0xbd8   : > { %2087 = shalt.err (!%p2084_p6)
}
 0xbd9   : > { %s2088_s22 = scalar_lea.hbm %s2595_s28, 128  ;;  %s2092_s19 = scalar_lea.hbm %s2686_s17, 256 }
 0xbda   : > { %p2089_p7 = scmp.ne.s32.totalorder %s2595_s28, %s2088_s22  ;;  %p2093_p0 = scmp.lt.u32.totalorder %s2595_s28, %s2686_s17 }
 0xbdb   : > { %p2094_p1 = scmp.lt.u32.totalorder %s2092_s19, %s2088_s22  ;;  %p2096_p13 = scmp.lt.u32.totalorder %s2088_s22, %s2595_s28 }
 0xbdc   : > { %p2090_p9 = pnand %p2089_p7, %p2687_p8 }
 0xbdd   : > { %p2095_p4 = por %p2094_p1, %p2093_p0 }
 0xbde   : > { %p2091_p12 = pneg %p2090_p9 }
 0xbdf   : > { %p2097_p10 = por %p2096_p13, %p2095_p4 }
 0xbe1   : > { %p2098_p11 = pnand %p2097_p10, %p2091_p12 }
 0xbe3   : > { %2101 = shalt.err (!%p2098_p11)
}
 0xbe4   : > { %1907 = dma.vmem_to_hbm [thread:$0]  (%p2687_p8), %s2597_s30, 128, %s2595_s28, %s1570_s23  }
 0xbe5 PF: > { %s2688_s16 = sld [smem:[#allocation15_spill]]  ;;  %s2689_s24 = sld [smem:[#allocation12_spill]] }
 0xbe6   : > { %s2690_s18 = sld [smem:[#allocation17_spill]] }
 0xbeb   : > { %p1924_p2 = scmp.ge.s32.totalorder %s2688_s16, 2  ;;  %s1596_s14 = sand.u32 1, %s2689_s24  }
 0xbec   : > { %p2691_p3 = scmp.ne.s32.totalorder %s2690_s18, 0  ;;  %s1597_s27 = scalar_lea.sflag [#allocation5], %s1596_s14 }
 0xbee   : > { %p1917_p5 = pnand %p1924_p2, %p2691_p3 }
 0xbf0   : > { %2135 = dma.done.wait (!%p1917_p5), %s1597_s27, 128  }
 0xbf1   : > { %2137 = vsyncadd (!%p1917_p5), %s1597_s27, 4294967168  ;;  %s31_s25 = sadd.s32 1, %s2688_s16   ;;  %s2692_s22 = sld [smem:[#allocation13_spill]] }
 0xbf2   : > { %p28_p6 = scmp.ge.s32.totalorder %s31_s25, 4   ;;  %s2693_s29 = sld [smem:[#allocation18_spill]] }
 0xbf3   : > { %s2694_s23 = sld [smem:[#allocation14_spill]]  ;;  %s2695_s24 = sld [smem:[#allocation16_spill]] }
 0xbf4   : > { %s2696_s20 = smov %s2144_s21  ;;  %30 = sbr.rel (!%p28_p6) target bundleno = 9 (0x9), region = 127 }
 0xbf7   : > { %s2697_s21 = smov %s2692_s22 }
 0xbf8   : > { %s2698_s22 = smov %s2693_s29 }
 0xbfb   :  { %1602 = vsyncpa [#allocation4], 1 }
 0xbfc   :  { %1604 = vsyncpa [#allocation4 + $0x1], 1 }
 0xbfd   :  { %1605 = vsyncpa [#allocation7], 1 }
 0xbfe   :  { %1606 = vsyncpa [#allocation5], 1 }
 0xbff   :  { %1608 = vsyncpa [#allocation5 + $0x1], 1 }

</bundles_post_ra>
